<compile_context>
chip_gen: v6e
topology: v6e:2x2x1
jax: 0.10.0
libtpu: 0.0.40
codegen_flags: <defaults>
</compile_context>

<pallas_src>
import jax
import jax.numpy as jnp
from jax.experimental import pallas as pl
from jax.experimental.pallas import tpu as pltpu


def _round_up(x, m):
    return ((x + m - 1) // m) * m


def _vmem_budget_bytes():
    # Physical per-core VMEM minus headroom for compiler scratch / semaphores:
    # ~56 MiB on v7x (64 MiB physical), ~112 MiB on v5e/v6e (128 MiB physical).
    try:
        cap = int(pltpu.get_tpu_info().vmem_capacity_bytes)
    except Exception:  # conservative fallback: v7x per-TC VMEM
        cap = 64 << 20
    return cap - max(8 << 20, cap // 8)


def fc_kernel(x_ref, w_ref, b_ref, o_ref):
    # One row-tile of feats against the resident weight block, f32 accumulate.
    acc = jnp.dot(x_ref[...], w_ref[...], preferred_element_type=jnp.float32)
    o_ref[...] = (acc + b_ref[...]).astype(o_ref.dtype)


def fc_layer_forward(feats, weight, bias, *, tm_max=2048):
    """Pallas implementation of FCLayer.forward.

    Args:
      feats:  (N, in_size) float32
      weight: (in_size, out_size) float32   (transposed vs. torch Linear)
      bias:   (1, out_size) float32
    Returns:
      (feats, x) with x = feats @ weight + bias, shape (N, out_size)
    """
    N, in_size = feats.shape
    out_size = weight.shape[1]
    itemsize = jnp.dtype(feats.dtype).itemsize

    # ---- row tiling ----------------------------------------------------------
    # Multiple of 8 (f32 sublane).  Big enough to amortize ~0.35us/grid-step
    # pipeline overhead, but (a) split so there are >=2 row blocks when possible
    # (v7x has two TensorCores sharing the "parallel" axis) and (b) small enough
    # that 2x(feats tile + out tile) + resident weight/bias fits the VMEM budget.
    tm = min(tm_max, _round_up(N, 8))
    if N > 8:
        tm = min(tm, _round_up(pl.cdiv(N, 2), 8))

    vmem_budget = _vmem_budget_bytes()
    fixed_bytes = (in_size * out_size + out_size) * itemsize       # resident W + b
    per_row_bytes = 2 * (in_size + out_size) * itemsize            # double-buffered tiles
    tm_vmem = ((vmem_budget - fixed_bytes) // per_row_bytes) // 8 * 8
    tm = max(8, min(tm, tm_vmem))

    grid = (pl.cdiv(N, tm),)  # ragged last block is masked by the pipeline

    # ---- cost estimate (advisory, true sizes) --------------------------------
    cost = pl.CostEstimate(
        flops=2 * N * in_size * out_size,
        transcendentals=0,
        bytes_accessed=(N * in_size + in_size * out_size + out_size
                        + N * out_size) * itemsize,
    )

    # ---- VMEM limit: actual footprint + slack, clamped to the budget ---------
    vmem_need = 2 * tm * (in_size + out_size) * itemsize + fixed_bytes
    vmem_limit = int(min(max(2 * vmem_need, 32 << 20), vmem_budget))

    x = pl.pallas_call(
        fc_kernel,
        out_shape=jax.ShapeDtypeStruct((N, out_size), feats.dtype),
        grid=grid,
        in_specs=[
            # feats: streamed, one row tile per grid step (double-buffered)
            pl.BlockSpec((tm, in_size), lambda i: (i, 0)),
            # weight / bias: constant index_map -> resident in VMEM (one DMA)
            pl.BlockSpec((in_size, out_size), lambda i: (0, 0)),
            pl.BlockSpec((1, out_size), lambda i: (0, 0)),
        ],
        out_specs=pl.BlockSpec((tm, out_size), lambda i: (i, 0)),
        compiler_params=pltpu.CompilerParams(
            dimension_semantics=("parallel",),
            vmem_limit_bytes=vmem_limit,
        ),
        cost_estimate=cost,
    )(feats, weight, bias)

    # TODO(synk): optionally stream feats/weight as bf16 (keeping the f32 MXU
    # accumulate) to halve the HBM read, and fuse this skinny GEMV into the
    # downstream DSMIL IClassifier/attention kernel so feats isn't re-read.
    return feats, x


if __name__ == "__main__":
    # Small shapes consistent with the module: a bag of N instance features.
    N = 16          # number of instances in the bag
    in_size = 32    # feature dimension
    out_size = 1    # FCLayer default out_size

    key = jax.random.PRNGKey(0)
    k_feats, k_w, k_b = jax.random.split(key, 3)

    feats = jax.random.normal(k_feats, (N, in_size), dtype=jnp.float32)

    # Deterministic parameter init mimicking nn.Linear's uniform(-1/sqrt(in), 1/sqrt(in)).
    bound = 1.0 / jnp.sqrt(jnp.float32(in_size))
    weight = jax.random.uniform(
        k_w, (in_size, out_size), dtype=jnp.float32, minval=-bound, maxval=bound
    )
    bias = jax.random.uniform(
        k_b, (1, out_size), dtype=jnp.float32, minval=-bound, maxval=bound
    )

    feats_out, x = fc_layer_forward(feats, weight, bias)
    jax.block_until_ready((feats_out, x))

    # Correctness check against plain JAX reference.
    x_ref = feats @ weight + bias
    assert feats_out.shape == (N, in_size)
    assert x.shape == (N, out_size)
    assert jnp.allclose(x, x_ref, atol=1e-5, rtol=1e-5)
    assert jnp.array_equal(feats_out, feats)

    print("KERNEL_OK")
</pallas_src>

<mosaic_0001>
module attributes {stable_mosaic.version = 11 : i64} {
  func.func @fc_kernel(%arg0: i32, %arg1: memref<8x32xf32, #tpu.memory_space<vmem>>, %arg2: memref<32x1xf32, #tpu.memory_space<vmem>>, %arg3: memref<1x1xf32, #tpu.memory_space<vmem>>, %arg4: memref<8x1xf32, #tpu.memory_space<vmem>>) attributes {dimension_semantics = [#tpu.dimension_semantics<parallel>], iteration_bounds = array<i64: 2>, scalar_prefetch = 0 : i64, scratch_operands = 0 : i64, tpu.core_type = #tpu.core_type<tc>, window_params = [{transform_indices = @transform_0, window_bounds = array<i64: 8, 32>}, {pipeline_mode = #tpu.pipeline_mode<synchronous>, transform_indices = @transform_1, window_bounds = array<i64: 32, 1>}, {pipeline_mode = #tpu.pipeline_mode<synchronous>, transform_indices = @transform_2, window_bounds = array<i64: 1, 1>}, {transform_indices = @transform_3, window_bounds = array<i64: 8, 1>}]} {
    %c0 = arith.constant 0 : index
    %c0_0 = arith.constant 0 : index
    %0 = vector.load %arg1[%c0, %c0_0] : memref<8x32xf32, #tpu.memory_space<vmem>>, vector<8x32xf32>
    %c0_1 = arith.constant 0 : index
    %c0_2 = arith.constant 0 : index
    %1 = vector.load %arg2[%c0_1, %c0_2] : memref<32x1xf32, #tpu.memory_space<vmem>>, vector<32x1xf32>
    %cst = arith.constant dense<0.000000e+00> : vector<8x1xf32>
    %2 = tpu.matmul %0, %1, %cst {dimension_numbers = #tpu.dot_dimension_numbers<[1], [0], [0], [1], [0, 0, 1, 1], [], []>} : vector<8x32xf32>, vector<32x1xf32>, vector<8x1xf32> -> vector<8x1xf32>
    %c0_3 = arith.constant 0 : index
    %c0_4 = arith.constant 0 : index
    %3 = vector.load %arg3[%c0_3, %c0_4] : memref<1x1xf32, #tpu.memory_space<vmem>>, vector<1x1xf32>
    %4 = vector.broadcast %3 : vector<1x1xf32> to vector<8x1xf32>
    %5 = arith.addf %2, %4 : vector<8x1xf32>
    %c0_5 = arith.constant 0 : index
    %c0_6 = arith.constant 0 : index
    %6 = vector.load %arg4[%c0_5, %c0_6] : memref<8x1xf32, #tpu.memory_space<vmem>>, vector<8x1xf32>
    tpu.vector_store %arg4[%c0_5, %c0_6], %5 {strides = array<i32>} : memref<8x1xf32, #tpu.memory_space<vmem>>, vector<8x1xf32>,
    return
  }
  func.func @transform_0(%arg0: i32) -> (i32, i32) {
    %c0_i32 = arith.constant 0 : i32
    %c0_i32_0 = arith.constant 0 : i32
    return %arg0, %c0_i32 : i32, i32
  }
  func.func @transform_1(%arg0: i32) -> (i32, i32) {
    %c0_i32 = arith.constant 0 : i32
    %c0_i32_0 = arith.constant 0 : i32
    %c0_i32_1 = arith.constant 0 : i32
    return %c0_i32, %c0_i32_0 : i32, i32
  }
  func.func @transform_2(%arg0: i32) -> (i32, i32) {
    %c0_i32 = arith.constant 0 : i32
    %c0_i32_0 = arith.constant 0 : i32
    %c0_i32_1 = arith.constant 0 : i32
    return %c0_i32, %c0_i32_0 : i32, i32
  }
  func.func @transform_3(%arg0: i32) -> (i32, i32) {
    %c0_i32 = arith.constant 0 : i32
    %c0_i32_0 = arith.constant 0 : i32
    return %arg0, %c0_i32 : i32, i32
  }
}

</mosaic_0001>

<bundles_post_ra>
// kernel: tpu_custom_call.1
= control target key start
LH: loop header
LB: loop body
LE: loop exit
PB: predicated region body
PF: predicated region fallthrough
CT: control target
= control target key end

     0   :  { %s379_s14 = smov 0   ;;  %s408_s0 = inlined_call_operand.vmem [shape: f32[16,32], index: 0, kind: input, shape index: {}]   ;;  %s409_s1 = inlined_call_operand.vmem [shape: f32[32,1], index: 1, kind: input, shape index: {}]   ;;  %s410_s2 = inlined_call_operand.<no memory space> [shape: f32[1,1], index: 2, kind: input, shape index: {}]   ;;  %s411_s3 = inlined_call_operand.vmem [shape: f32[16,1], index: 3, kind: output, shape index: {}]  }
   0x1   :  { %v8_v0 = vstv %s410_s2 }
   0x2   :  { %9 = vst [vmem:[#allocation2] sm:$0x1] %v8_v0 }
   0x3 LB: > { %s309_s15 = sadd.s32 4294967295, %s352_s14   ;;  %p313_p0 = scmp.ge.s32.totalorder %s352_s14, 1  ;;  %s352_s14 = sphi %s379_s14, %s15_s14  }
   0x4   : > { %p138_p1 = scmp.lt.s32.totalorder %s352_s14, 3 }
   0x6   : > { %p139_p2 = pnand %p313_p0, %p138_p1 }
   0x7   : > { %p160_p3 = scmp.lt.s32.totalorder (!%p139_p2), %s309_s15, 1 }
   0x8   : > { %142 = sbr.rel (%p139_p2) target bundleno = 218 (0xda), region = 32 }
   0xd   : > { %v172_v1 = vld [vmem:[%s409_s1 + $0x18] sm:$0xff]  ;;  %v354_v2 = vmov 0.0   ;;  %v171_v3 = vld [vmem:[%s409_s1 + $0x10] sm:$0xff]  ;;  %vm355_vm0 = vmmov 0   ;;  %s413_s15 = smov (!%p160_p3, %s309_s15), 1  ;;  %v170_v4 = vld [vmem:[%s409_s1 + $0x8] sm:$0xff] }
   0xe   : > { %325 = vmatprep.subr.mxu0 %v354_v2  ;;  %333 = vmatprep.mubr.msk.f32.mxu0 %vm355_vm0, %v354_v2  ;;  %s314_s21 = sshll.u32 %s413_s15, 3  ;;  %v169_v5 = vld [vmem:[%s409_s1] sm:$0xff]  ;;  %vm180_vm1 = vcmask 261120   ;;  %vm254_vm2 = vcmask 7168  }
   0xf   : > { %326 = vmatpush3.msra.mxu0 %v172_v1  ;;  %s163_s26 = scalar_lea.vmem %s408_s0, %s314_s21  ;;  %v316_v7 = vld [vmem:[#allocation2] ss:$0 sm:$0xff]  ;;  %s167_s29 = scalar_lea.vmem %s411_s3, %s314_s21 }
  0x10   : > { %327 = vmatprep.subr.mxu0 %v354_v2  ;;  %v168_v6 = vld [vmem:[%s163_s26] sm:$0xff] }
  0x11   : > { %328 = vmatpush3.msra.mxu0 %v171_v3 }
  0x12   : > { %329 = vmatprep.subr.mxu0 %v354_v2 }
  0x13   : > { %330 = vmatpush3.msra.mxu0 %v170_v4 }
  0x14   : > { %331 = vmatprep.subr.mxu0 %v354_v2 }
  0x15   : > { %332 = vmatpush3.msra.mxu0 %v169_v5 }
  0x16   : > { %334 = vmatmul.mubr.msk.f32.vlgmr.msra.gmra.mxu0 %vm180_vm1, %v168_v6 }
  0xd6   : > { %v250_v8 = vpop.f32.mrf.mxu0 }
  0xd7   : > { %v251_v9 = vadd.f32 %v316_v7, %v250_v8 }
  0xd8   : > { %v335_v10 = vpop.f32.mrf.mxu0 }
  0xd9   : > { %255 = vst.msk [vmem:[%s167_s29] sm:$0xff] %vm254_vm2, %v251_v9 }
  0xda PF: > { %s15_s14 = sadd.s32 1, %s352_s14  }
  0xdb   : > { %p12_p4 = scmp.ge.s32.totalorder %s15_s14, 4  }
  0xdd   :  { %14 = sbr.rel (!%p12_p4) target bundleno = 3 (0x3), region = 62 }

</bundles_post_ra>
